<compile_context>
chip_gen: v5e
topology: v5e:2x2
jax: 0.10.0
libtpu: 0.0.40
codegen_flags: <defaults>
</compile_context>

<pallas_src>
from functools import partial

import jax
import jax.numpy as jnp
from jax.experimental import pallas as pl
from jax.experimental.pallas import tpu as pltpu


def _round_up(x, m):
    return (x + m - 1) // m * m


def _tap_table(S):
    """For each 3x3 tap (kh, kw): (quadrant index, row shift, col shift) on the
    (Ho, Wo) output grid of the polyphase-decomposed input (S=1 -> q=0)."""
    taps = []
    for kh in range(3):
        for kw in range(3):
            rh = (kh - 1) % S
            dh = (kh - 1 - rh) // S
            rw = (kw - 1) % S
            dw = (kw - 1 - rw) // S
            taps.append((rh * S + rw, dh, dw))
    return taps


def _im2col_weights(w, c_pad, dtype):
    """(C_out, C_in, 3, 3) OIHW -> (C_out, 9*c_pad), tap-major / channel-minor,
    channels zero-padded per tap to c_pad (sublane alignment of the patch)."""
    c_out, c_in = w.shape[0], w.shape[1]
    wt = jnp.transpose(w, (0, 2, 3, 1))                       # (C_out, 3, 3, C_in)
    wt = jnp.pad(wt, ((0, 0), (0, 0), (0, 0), (0, c_pad - c_in)))
    return wt.reshape(c_out, 9 * c_pad).astype(dtype)


def _polyphase(x, S):
    """NCHW -> (N, S*S*C, Ho*Wo): quadrant-major / channel-minor space-to-depth.
    Pure layout (cheap XLA reshape/transpose); S == 1 is a plain reshape."""
    N, C, H, W = x.shape
    Ho, Wo = H // S, W // S
    if S == 1:
        return x.reshape(N, C, Ho * Wo)
    xq = x.reshape(N, C, Ho, S, Wo, S)
    xq = jnp.transpose(xq, (0, 3, 5, 1, 2, 4))                # (N, rh, rw, C, Ho, Wo)
    return xq.reshape(N, S * S * C, Ho * Wo)


# ---------------- fully fused BasicBlock kernel ----------------

def _make_block_kernel(C_in, C_out, Ho, Wo, S, has_shortcut, Cp1, Cp2,
                       ioff, scr, cdt):
    HoWo = Ho * Wo
    n_q = S * S
    taps1 = _tap_table(S)        # conv1 taps on the polyphase grid
    taps2 = _tap_table(1)        # conv2 taps (stride 1) on the (Ho, Wo) grid

    def kernel(*refs):
        if has_shortcut:
            (x_ref, s1_ref, b1_ref, w1_ref, m_ref, s2_ref, b2_ref, w2_ref,
             wsc_ref, o_ref, xh1, p1, xh2, p2) = refs
        else:
            (x_ref, s1_ref, b1_ref, w1_ref, m_ref, s2_ref, b2_ref, w2_ref,
             o_ref, xh1, p1, xh2, p2) = refs
            wsc_ref = None

        # ---- zero ONLY the halo strips (interiors are fully overwritten below)
        xh1[:, 0:ioff] = jnp.zeros((n_q * C_in, ioff), cdt)
        xh1[:, ioff + HoWo:scr] = jnp.zeros((n_q * C_in, scr - ioff - HoWo), cdt)
        xh2[:, 0:ioff] = jnp.zeros((C_out, ioff), cdt)
        xh2[:, ioff + HoWo:scr] = jnp.zeros((C_out, scr - ioff - HoWo), cdt)
        # sublane-pad rows of the patches (absent at real, aligned widths)
        if Cp1 > C_in:
            for k in range(9):
                p1[k * Cp1 + C_in:(k + 1) * Cp1, :] = jnp.zeros((Cp1 - C_in, HoWo), cdt)
        if Cp2 > C_out:
            for k in range(9):
                p2[k * Cp2 + C_out:(k + 1) * Cp2, :] = jnp.zeros((Cp2 - C_out, HoWo), cdt)

        # ---- pre1: eval BatchNorm + ReLU in f32 (VPU), cast ONCE into the halo
        a1 = jnp.maximum(x_ref[0] * s1_ref[...] + b1_ref[...], 0.0)
        xh1[:, ioff:ioff + HoWo] = a1.astype(cdt)

        # ---- conv1 im2col: every tap (incl. stride 2) is a contiguous lane
        #      slice of one quadrant; left/right row-wrap columns are masked.
        for k, (q, dh, dw) in enumerate(taps1):
            start = ioff + dh * Wo + dw
            tap = xh1[q * C_in:(q + 1) * C_in, start:start + HoWo]
            if dw != 0:
                tap = tap * m_ref[dw + 1:dw + 2, :]
            p1[k * Cp1:k * Cp1 + C_in, :] = tap

        # ---- conv1: one bf16 MXU matmul, f32 accumulation
        o1 = jnp.dot(w1_ref[...], p1[...], preferred_element_type=jnp.float32)

        # ---- residual branch
        if has_shortcut:
            # 1x1 (strided) shortcut conv on the SAME pre-activation: quadrant
            # (0, 0) of the halo scratch is exactly the stride-subsampled a1.
            res = jnp.dot(wsc_ref[...], xh1[0:C_in, ioff:ioff + HoWo],
                          preferred_element_type=jnp.float32)
        else:
            res = x_ref[0]            # identity shortcut: original (pre-BN) input

        # TODO(synk): F.dropout with p>0 in training mode not implemented
        #             (module default p=0.0 -> no-op).

        # ---- pre2: BN + ReLU on o1, kept entirely in VMEM (no HBM round-trip)
        a2 = jnp.maximum(o1 * s2_ref[...] + b2_ref[...], 0.0)
        xh2[:, ioff:ioff + HoWo] = a2.astype(cdt)

        # ---- conv2 (stride 1): im2col + one MXU matmul
        for k, (q, dh, dw) in enumerate(taps2):
            start = ioff + dh * Wo + dw
            tap = xh2[:, start:start + HoWo]
            if dw != 0:
                tap = tap * m_ref[dw + 1:dw + 2, :]
            p2[k * Cp2:k * Cp2 + C_out, :] = tap
        o2 = jnp.dot(w2_ref[...], p2[...], preferred_element_type=jnp.float32)

        # ---- fused residual add + store
        o_ref[...] = (res + o2).reshape(1, C_out, HoWo).astype(o_ref.dtype)

    return kernel


@partial(jax.jit,
         static_argnames=("stride", "in_planes", "out_planes", "compute_dtype"))
def basic_block_pallas(x_nchw, p, *, stride, in_planes, out_planes,
                       compute_dtype=jnp.bfloat16):
    equal = in_planes == out_planes
    assert not (equal and stride != 1), "identity shortcut requires stride == 1"
    N, C, H, W = x_nchw.shape
    assert C == in_planes and H % stride == 0 and W % stride == 0
    S = stride
    Ho, Wo = H // S, W // S
    HoWo = Ho * Wo
    cdt = compute_dtype
    pack = 8 if cdt == jnp.float32 else 16    # sublane pack of the patch dtype

    # eval-mode BatchNorm folded into per-channel scale / shift (wrapper glue)
    s1 = p['bn1_g'] * jax.lax.rsqrt(p['bn1_v'] + 1e-5)
    b1 = p['bn1_b'] - p['bn1_m'] * s1
    s2 = p['bn2_g'] * jax.lax.rsqrt(p['bn2_v'] + 1e-5)
    b2 = p['bn2_b'] - p['bn2_m'] * s2

    # conv weights -> im2col layout, per-tap channel blocks padded to the pack
    Cp1 = _round_up(in_planes, pack)
    Cp2 = _round_up(out_planes, pack)
    w1m = _im2col_weights(p['w1'], Cp1, cdt)                  # (C_out, 9*Cp1)
    w2m = _im2col_weights(p['w2'], Cp2, cdt)                  # (C_out, 9*Cp2)

    # polyphase (space-to-depth) view of the input for the strided conv
    xq = _polyphase(x_nchw, S)                                # (N, S*S*C_in, Ho*Wo)
    s1t = jnp.tile(s1, S * S).reshape(S * S * in_planes, 1)
    b1t = jnp.tile(b1, S * S).reshape(S * S * in_planes, 1)

    # left / right row-wrap masks on the (Ho, Wo) grid (shared by both convs)
    j = jnp.arange(HoWo, dtype=jnp.int32) % Wo
    masks = jnp.stack([(j != 0).astype(cdt),
                       jnp.ones((HoWo,), cdt),
                       (j != Wo - 1).astype(cdt)], axis=0)    # (3, Ho*Wo)

    # halo geometry: interior starts at a 128-aligned lane offset; both convs
    # operate on the same (Ho, Wo) grid, so they share one geometry.
    ioff = _round_up(Wo + 1, 128)
    scr = _round_up(ioff + HoWo + Wo + 2, 128)

    inputs = [xq, s1t, b1t, w1m, masks,
              s2.reshape(out_planes, 1), b2.reshape(out_planes, 1), w2m]
    in_specs = [
        pl.BlockSpec((1, S * S * in_planes, HoWo), lambda n: (n, 0, 0)),
        pl.BlockSpec((S * S * in_planes, 1), lambda n: (0, 0)),
        pl.BlockSpec((S * S * in_planes, 1), lambda n: (0, 0)),
        pl.BlockSpec((out_planes, 9 * Cp1), lambda n: (0, 0)),
        pl.BlockSpec((3, HoWo), lambda n: (0, 0)),
        pl.BlockSpec((out_planes, 1), lambda n: (0, 0)),
        pl.BlockSpec((out_planes, 1), lambda n: (0, 0)),
        pl.BlockSpec((out_planes, 9 * Cp2), lambda n: (0, 0)),
    ]
    if not equal:
        inputs.append(p['w_sc'][:, :, 0, 0].astype(cdt))      # (C_out, C_in)
        in_specs.append(pl.BlockSpec((out_planes, in_planes), lambda n: (0, 0)))

    kernel = _make_block_kernel(in_planes, out_planes, Ho, Wo, S,
                                has_shortcut=not equal, Cp1=Cp1, Cp2=Cp2,
                                ioff=ioff, scr=scr, cdt=cdt)

    # NOTE: grid is just the batch at toy sizes; at real WRN widths add parallel
    # C_out / spatial axes (see header comments) for pipelining + megacore.
    out = pl.pallas_call(
        kernel,
        out_shape=jax.ShapeDtypeStruct((N, out_planes, HoWo), x_nchw.dtype),
        grid=(N,),
        in_specs=in_specs,
        out_specs=pl.BlockSpec((1, out_planes, HoWo), lambda n: (n, 0, 0)),
        scratch_shapes=[
            pltpu.VMEM((S * S * in_planes, scr), cdt),        # halo'd a1 (quadrants)
            pltpu.VMEM((9 * Cp1, HoWo), cdt),                 # conv1 im2col patch
            pltpu.VMEM((out_planes, scr), cdt),               # halo'd a2
            pltpu.VMEM((9 * Cp2, HoWo), cdt),                 # conv2 im2col patch
        ],
        compiler_params=pltpu.CompilerParams(
            dimension_semantics=("parallel",)),
    )(*inputs)
    return out.reshape(N, out_planes, Ho, Wo)


# ---------------- pure-JAX reference (for verification) ----------------

def basic_block_reference(x, p, stride, in_planes, out_planes):
    equal = in_planes == out_planes

    def bn_relu_nchw(z, g, b, m, v):
        s = (g * jax.lax.rsqrt(v + 1e-5))[None, :, None, None]
        sh = (b - m * g * jax.lax.rsqrt(v + 1e-5))[None, :, None, None]
        return jnp.maximum(z * s + sh, 0.0)

    def conv(z, w, s, pad):
        return jax.lax.conv_general_dilated(
            z, w, (s, s), [(pad, pad), (pad, pad)],
            dimension_numbers=('NCHW', 'OIHW', 'NCHW'))

    act1 = bn_relu_nchw(x, p['bn1_g'], p['bn1_b'], p['bn1_m'], p['bn1_v'])
    o = conv(act1, p['w1'], stride, 1)
    o = bn_relu_nchw(o, p['bn2_g'], p['bn2_b'], p['bn2_m'], p['bn2_v'])
    o = conv(o, p['w2'], 1, 1)
    res = x if equal else conv(act1, p['w_sc'], stride, 0)
    return res + o


# ---------------- deterministic parameter init ----------------

def init_params(key, cin, cout, equal):
    ks = jax.random.split(key, 11)
    p = {
        'w1': 0.1 * jax.random.normal(ks[0], (cout, cin, 3, 3), jnp.float32),
        'w2': 0.1 * jax.random.normal(ks[1], (cout, cout, 3, 3), jnp.float32),
        'bn1_g': 1.0 + 0.1 * jax.random.normal(ks[2], (cin,), jnp.float32),
        'bn1_b': 0.1 * jax.random.normal(ks[3], (cin,), jnp.float32),
        'bn1_m': 0.1 * jax.random.normal(ks[4], (cin,), jnp.float32),
        'bn1_v': 1.0 + 0.1 * jnp.abs(jax.random.normal(ks[5], (cin,), jnp.float32)),
        'bn2_g': 1.0 + 0.1 * jax.random.normal(ks[6], (cout,), jnp.float32),
        'bn2_b': 0.1 * jax.random.normal(ks[7], (cout,), jnp.float32),
        'bn2_m': 0.1 * jax.random.normal(ks[8], (cout,), jnp.float32),
        'bn2_v': 1.0 + 0.1 * jnp.abs(jax.random.normal(ks[9], (cout,), jnp.float32)),
    }
    if not equal:
        p['w_sc'] = 0.1 * jax.random.normal(ks[10], (cout, cin, 1, 1), jnp.float32)
    return p


if __name__ == "__main__":
    key = jax.random.PRNGKey(0)
    kx, kpa, kpb = jax.random.split(key, 3)

    N, H, W = 2, 16, 16

    # ---- Block A: in=4 -> out=8, stride=2 (convShortcut path)
    cin_a, cout_a, stride_a = 4, 8, 2
    x_a = jax.random.normal(kx, (N, cin_a, H, W), jnp.float32)
    p_a = init_params(kpa, cin_a, cout_a, equal=False)
    ref_a = basic_block_reference(x_a, p_a, stride_a, cin_a, cout_a)

    # structural check in f32 (tight tolerance)
    out_a32 = jax.block_until_ready(basic_block_pallas(
        x_a, p_a, stride=stride_a, in_planes=cin_a, out_planes=cout_a,
        compute_dtype=jnp.float32))
    assert out_a32.shape == (N, cout_a, H // stride_a, W // stride_a)
    assert jnp.allclose(out_a32, ref_a, atol=2e-4, rtol=2e-4), \
        float(jnp.max(jnp.abs(out_a32 - ref_a)))

    # performance path: bf16 MXU matmuls, f32 accumulation (looser tolerance)
    out_a = jax.block_until_ready(basic_block_pallas(
        x_a, p_a, stride=stride_a, in_planes=cin_a, out_planes=cout_a))
    assert jnp.allclose(out_a, ref_a, atol=6e-2, rtol=6e-2), \
        float(jnp.max(jnp.abs(out_a - ref_a)))

    # ---- Block B: in=8 -> out=8, stride=1 (identity shortcut), chained off A
    cin_b, cout_b, stride_b = 8, 8, 1
    x_b = out_a32
    p_b = init_params(kpb, cin_b, cout_b, equal=True)
    ref_b = basic_block_reference(x_b, p_b, stride_b, cin_b, cout_b)

    out_b32 = jax.block_until_ready(basic_block_pallas(
        x_b, p_b, stride=stride_b, in_planes=cin_b, out_planes=cout_b,
        compute_dtype=jnp.float32))
    assert out_b32.shape == x_b.shape
    assert jnp.allclose(out_b32, ref_b, atol=2e-4, rtol=2e-4), \
        float(jnp.max(jnp.abs(out_b32 - ref_b)))

    out_b = jax.block_until_ready(basic_block_pallas(
        x_b, p_b, stride=stride_b, in_planes=cin_b, out_planes=cout_b))
    assert jnp.allclose(out_b, ref_b, atol=6e-2, rtol=6e-2), \
        float(jnp.max(jnp.abs(out_b - ref_b)))

    print("KERNEL_OK")
</pallas_src>

<mosaic_0001>
module attributes {stable_mosaic.version = 11 : i64} {
  func.func @kernel(%arg0: i32, %arg1: memref<1x16x64xf32, #tpu.memory_space<vmem>>, %arg2: memref<16x1xf32, #tpu.memory_space<vmem>>, %arg3: memref<16x1xf32, #tpu.memory_space<vmem>>, %arg4: memref<8x72xf32, #tpu.memory_space<vmem>>, %arg5: memref<3x64xf32, #tpu.memory_space<vmem>>, %arg6: memref<8x1xf32, #tpu.memory_space<vmem>>, %arg7: memref<8x1xf32, #tpu.memory_space<vmem>>, %arg8: memref<8x72xf32, #tpu.memory_space<vmem>>, %arg9: memref<8x4xf32, #tpu.memory_space<vmem>>, %arg10: memref<1x8x64xf32, #tpu.memory_space<vmem>>, %arg11: memref<16x256xf32, #tpu.memory_space<vmem>>, %arg12: memref<72x64xf32, #tpu.memory_space<vmem>>, %arg13: memref<8x256xf32, #tpu.memory_space<vmem>>, %arg14: memref<72x64xf32, #tpu.memory_space<vmem>>) attributes {dimension_semantics = [#tpu.dimension_semantics<parallel>], iteration_bounds = array<i64: 2>, scalar_prefetch = 0 : i64, scratch_operands = 4 : i64, tpu.core_type = #tpu.core_type<tc>, window_params = [{transform_indices = @transform_0, window_bounds = array<i64: 1, 16, 64>}, {pipeline_mode = #tpu.pipeline_mode<synchronous>, transform_indices = @transform_1, window_bounds = array<i64: 16, 1>}, {pipeline_mode = #tpu.pipeline_mode<synchronous>, transform_indices = @transform_2, window_bounds = array<i64: 16, 1>}, {pipeline_mode = #tpu.pipeline_mode<synchronous>, transform_indices = @transform_3, window_bounds = array<i64: 8, 72>}, {pipeline_mode = #tpu.pipeline_mode<synchronous>, transform_indices = @transform_4, window_bounds = array<i64: 3, 64>}, {pipeline_mode = #tpu.pipeline_mode<synchronous>, transform_indices = @transform_5, window_bounds = array<i64: 8, 1>}, {pipeline_mode = #tpu.pipeline_mode<synchronous>, transform_indices = @transform_6, window_bounds = array<i64: 8, 1>}, {pipeline_mode = #tpu.pipeline_mode<synchronous>, transform_indices = @transform_7, window_bounds = array<i64: 8, 72>}, {pipeline_mode = #tpu.pipeline_mode<synchronous>, transform_indices = @transform_8, window_bounds = array<i64: 8, 4>}, {transform_indices = @transform_9, window_bounds = array<i64: 1, 8, 64>}]} {
    %cst = arith.constant 0.000000e+00 : f32
    %0 = vector.broadcast %cst : f32 to vector<16x128xf32>
    %c0 = arith.constant 0 : index
    %c0_0 = arith.constant 0 : index
    %1 = vector.load %arg11[%c0, %c0_0] : memref<16x256xf32, #tpu.memory_space<vmem>>, vector<16x128xf32>
    tpu.vector_store %arg11[%c0, %c0_0], %0 {strides = array<i32>} : memref<16x256xf32, #tpu.memory_space<vmem>>, vector<16x128xf32>,
    %cst_1 = arith.constant 0.000000e+00 : f32
    %2 = vector.broadcast %cst_1 : f32 to vector<16x64xf32>
    %c0_2 = arith.constant 0 : index
    %c192 = arith.constant 192 : index
    %3 = vector.load %arg11[%c0_2, %c192] : memref<16x256xf32, #tpu.memory_space<vmem>>, vector<16x64xf32>
    tpu.vector_store %arg11[%c0_2, %c192], %2 {strides = array<i32>} : memref<16x256xf32, #tpu.memory_space<vmem>>, vector<16x64xf32>,
    %cst_3 = arith.constant 0.000000e+00 : f32
    %4 = vector.broadcast %cst_3 : f32 to vector<8x128xf32>
    %c0_4 = arith.constant 0 : index
    %c0_5 = arith.constant 0 : index
    %5 = vector.load %arg13[%c0_4, %c0_5] : memref<8x256xf32, #tpu.memory_space<vmem>>, vector<8x128xf32>
    tpu.vector_store %arg13[%c0_4, %c0_5], %4 {strides = array<i32>} : memref<8x256xf32, #tpu.memory_space<vmem>>, vector<8x128xf32>,
    %cst_6 = arith.constant 0.000000e+00 : f32
    %6 = vector.broadcast %cst_6 : f32 to vector<8x64xf32>
    %c0_7 = arith.constant 0 : index
    %c192_8 = arith.constant 192 : index
    %7 = vector.load %arg13[%c0_7, %c192_8] : memref<8x256xf32, #tpu.memory_space<vmem>>, vector<8x64xf32>
    tpu.vector_store %arg13[%c0_7, %c192_8], %6 {strides = array<i32>} : memref<8x256xf32, #tpu.memory_space<vmem>>, vector<8x64xf32>,
    %cst_9 = arith.constant 0.000000e+00 : f32
    %8 = vector.broadcast %cst_9 : f32 to vector<4x64xf32>
    %c4 = arith.constant 4 : index
    %c0_10 = arith.constant 0 : index
    %9 = vector.load %arg12[%c4, %c0_10] : memref<72x64xf32, #tpu.memory_space<vmem>>, vector<4x64xf32>
    tpu.vector_store %arg12[%c4, %c0_10], %8 {strides = array<i32>} : memref<72x64xf32, #tpu.memory_space<vmem>>, vector<4x64xf32>,
    %cst_11 = arith.constant 0.000000e+00 : f32
    %10 = vector.broadcast %cst_11 : f32 to vector<4x64xf32>
    %c12 = arith.constant 12 : index
    %c0_12 = arith.constant 0 : index
    %11 = vector.load %arg12[%c12, %c0_12] : memref<72x64xf32, #tpu.memory_space<vmem>>, vector<4x64xf32>
    tpu.vector_store %arg12[%c12, %c0_12], %10 {strides = array<i32>} : memref<72x64xf32, #tpu.memory_space<vmem>>, vector<4x64xf32>,
    %cst_13 = arith.constant 0.000000e+00 : f32
    %12 = vector.broadcast %cst_13 : f32 to vector<4x64xf32>
    %c20 = arith.constant 20 : index
    %c0_14 = arith.constant 0 : index
    %13 = vector.load %arg12[%c20, %c0_14] : memref<72x64xf32, #tpu.memory_space<vmem>>, vector<4x64xf32>
    tpu.vector_store %arg12[%c20, %c0_14], %12 {strides = array<i32>} : memref<72x64xf32, #tpu.memory_space<vmem>>, vector<4x64xf32>,
    %cst_15 = arith.constant 0.000000e+00 : f32
    %14 = vector.broadcast %cst_15 : f32 to vector<4x64xf32>
    %c28 = arith.constant 28 : index
    %c0_16 = arith.constant 0 : index
    %15 = vector.load %arg12[%c28, %c0_16] : memref<72x64xf32, #tpu.memory_space<vmem>>, vector<4x64xf32>
    tpu.vector_store %arg12[%c28, %c0_16], %14 {strides = array<i32>} : memref<72x64xf32, #tpu.memory_space<vmem>>, vector<4x64xf32>,
    %cst_17 = arith.constant 0.000000e+00 : f32
    %16 = vector.broadcast %cst_17 : f32 to vector<4x64xf32>
    %c36 = arith.constant 36 : index
    %c0_18 = arith.constant 0 : index
    %17 = vector.load %arg12[%c36, %c0_18] : memref<72x64xf32, #tpu.memory_space<vmem>>, vector<4x64xf32>
    tpu.vector_store %arg12[%c36, %c0_18], %16 {strides = array<i32>} : memref<72x64xf32, #tpu.memory_space<vmem>>, vector<4x64xf32>,
    %cst_19 = arith.constant 0.000000e+00 : f32
    %18 = vector.broadcast %cst_19 : f32 to vector<4x64xf32>
    %c44 = arith.constant 44 : index
    %c0_20 = arith.constant 0 : index
    %19 = vector.load %arg12[%c44, %c0_20] : memref<72x64xf32, #tpu.memory_space<vmem>>, vector<4x64xf32>
    tpu.vector_store %arg12[%c44, %c0_20], %18 {strides = array<i32>} : memref<72x64xf32, #tpu.memory_space<vmem>>, vector<4x64xf32>,
    %cst_21 = arith.constant 0.000000e+00 : f32
    %20 = vector.broadcast %cst_21 : f32 to vector<4x64xf32>
    %c52 = arith.constant 52 : index
    %c0_22 = arith.constant 0 : index
    %21 = vector.load %arg12[%c52, %c0_22] : memref<72x64xf32, #tpu.memory_space<vmem>>, vector<4x64xf32>
    tpu.vector_store %arg12[%c52, %c0_22], %20 {strides = array<i32>} : memref<72x64xf32, #tpu.memory_space<vmem>>, vector<4x64xf32>,
    %cst_23 = arith.constant 0.000000e+00 : f32
    %22 = vector.broadcast %cst_23 : f32 to vector<4x64xf32>
    %c60 = arith.constant 60 : index
    %c0_24 = arith.constant 0 : index
    %23 = vector.load %arg12[%c60, %c0_24] : memref<72x64xf32, #tpu.memory_space<vmem>>, vector<4x64xf32>
    tpu.vector_store %arg12[%c60, %c0_24], %22 {strides = array<i32>} : memref<72x64xf32, #tpu.memory_space<vmem>>, vector<4x64xf32>,
    %cst_25 = arith.constant 0.000000e+00 : f32
    %24 = vector.broadcast %cst_25 : f32 to vector<4x64xf32>
    %c68 = arith.constant 68 : index
    %c0_26 = arith.constant 0 : index
    %25 = vector.load %arg12[%c68, %c0_26] : memref<72x64xf32, #tpu.memory_space<vmem>>, vector<4x64xf32>
    tpu.vector_store %arg12[%c68, %c0_26], %24 {strides = array<i32>} : memref<72x64xf32, #tpu.memory_space<vmem>>, vector<4x64xf32>,
    %c0_27 = arith.constant 0 : index
    %c0_28 = arith.constant 0 : index
    %c0_29 = arith.constant 0 : index
    %26 = vector.load %arg1[%c0_27, %c0_28, %c0_29] : memref<1x16x64xf32, #tpu.memory_space<vmem>>, vector<1x16x64xf32>
    %27 = vector.shape_cast %26 : vector<1x16x64xf32> to vector<16x64xf32>
    %c0_30 = arith.constant 0 : index
    %c0_31 = arith.constant 0 : index
    %28 = vector.load %arg2[%c0_30, %c0_31] : memref<16x1xf32, #tpu.memory_space<vmem>>, vector<16x1xf32>
    %29 = vector.broadcast %28 : vector<16x1xf32> to vector<16x64xf32>
    %30 = arith.mulf %27, %29 : vector<16x64xf32>
    %c0_32 = arith.constant 0 : index
    %c0_33 = arith.constant 0 : index
    %31 = vector.load %arg3[%c0_32, %c0_33] : memref<16x1xf32, #tpu.memory_space<vmem>>, vector<16x1xf32>
    %32 = vector.broadcast %31 : vector<16x1xf32> to vector<16x64xf32>
    %33 = arith.addf %30, %32 : vector<16x64xf32>
    %cst_34 = arith.constant 0.000000e+00 : f32
    %34 = vector.broadcast %cst_34 : f32 to vector<16x64xf32>
    %35 = arith.maximumf %33, %34 : vector<16x64xf32>
    %c0_35 = arith.constant 0 : index
    %c128 = arith.constant 128 : index
    %36 = vector.load %arg11[%c0_35, %c128] : memref<16x256xf32, #tpu.memory_space<vmem>>, vector<16x64xf32>
    tpu.vector_store %arg11[%c0_35, %c128], %35 {strides = array<i32>} : memref<16x256xf32, #tpu.memory_space<vmem>>, vector<16x64xf32>,
    %c12_36 = arith.constant 12 : index
    %c119 = arith.constant 119 : index
    %37 = vector.load %arg11[%c12_36, %c119] : memref<16x256xf32, #tpu.memory_space<vmem>>, vector<4x64xf32>
    %c0_37 = arith.constant 0 : index
    %c0_38 = arith.constant 0 : index
    %38 = vector.load %arg5[%c0_37, %c0_38] : memref<3x64xf32, #tpu.memory_space<vmem>>, vector<1x64xf32>
    %39 = vector.broadcast %38 : vector<1x64xf32> to vector<4x64xf32>
    %40 = arith.mulf %37, %39 : vector<4x64xf32>
    %c0_39 = arith.constant 0 : index
    %c0_40 = arith.constant 0 : index
    %41 = vector.load %arg12[%c0_39, %c0_40] : memref<72x64xf32, #tpu.memory_space<vmem>>, vector<4x64xf32>
    tpu.vector_store %arg12[%c0_39, %c0_40], %40 {strides = array<i32>} : memref<72x64xf32, #tpu.memory_space<vmem>>, vector<4x64xf32>,
    %c8 = arith.constant 8 : index
    %c120 = arith.constant 120 : index
    %42 = vector.load %arg11[%c8, %c120] : memref<16x256xf32, #tpu.memory_space<vmem>>, vector<4x64xf32>
    %c8_41 = arith.constant 8 : index
    %c0_42 = arith.constant 0 : index
    %43 = vector.load %arg12[%c8_41, %c0_42] : memref<72x64xf32, #tpu.memory_space<vmem>>, vector<4x64xf32>
    tpu.vector_store %arg12[%c8_41, %c0_42], %42 {strides = array<i32>} : memref<72x64xf32, #tpu.memory_space<vmem>>, vector<4x64xf32>,
    %c12_43 = arith.constant 12 : index
    %c120_44 = arith.constant 120 : index
    %44 = vector.load %arg11[%c12_43, %c120_44] : memref<16x256xf32, #tpu.memory_space<vmem>>, vector<4x64xf32>
    %c16 = arith.constant 16 : index
    %c0_45 = arith.constant 0 : index
    %45 = vector.load %arg12[%c16, %c0_45] : memref<72x64xf32, #tpu.memory_space<vmem>>, vector<4x64xf32>
    tpu.vector_store %arg12[%c16, %c0_45], %44 {strides = array<i32>} : memref<72x64xf32, #tpu.memory_space<vmem>>, vector<4x64xf32>,
    %c4_46 = arith.constant 4 : index
    %c127 = arith.constant 127 : index
    %46 = vector.load %arg11[%c4_46, %c127] : memref<16x256xf32, #tpu.memory_space<vmem>>, vector<4x64xf32>
    %c0_47 = arith.constant 0 : index
    %c0_48 = arith.constant 0 : index
    %47 = vector.load %arg5[%c0_47, %c0_48] : memref<3x64xf32, #tpu.memory_space<vmem>>, vector<1x64xf32>
    %48 = vector.broadcast %47 : vector<1x64xf32> to vector<4x64xf32>
    %49 = arith.mulf %46, %48 : vector<4x64xf32>
    %c24 = arith.constant 24 : index
    %c0_49 = arith.constant 0 : index
    %50 = vector.load %arg12[%c24, %c0_49] : memref<72x64xf32, #tpu.memory_space<vmem>>, vector<4x64xf32>
    tpu.vector_store %arg12[%c24, %c0_49], %49 {strides = array<i32>} : memref<72x64xf32, #tpu.memory_space<vmem>>, vector<4x64xf32>,
    %c0_50 = arith.constant 0 : index
    %c128_51 = arith.constant 128 : index
    %51 = vector.load %arg11[%c0_50, %c128_51] : memref<16x256xf32, #tpu.memory_space<vmem>>, vector<4x64xf32>
    %c32 = arith.constant 32 : index
    %c0_52 = arith.constant 0 : index
    %52 = vector.load %arg12[%c32, %c0_52] : memref<72x64xf32, #tpu.memory_space<vmem>>, vector<4x64xf32>
    tpu.vector_store %arg12[%c32, %c0_52], %51 {strides = array<i32>} : memref<72x64xf32, #tpu.memory_space<vmem>>, vector<4x64xf32>,
    %c4_53 = arith.constant 4 : index
    %c128_54 = arith.constant 128 : index
    %53 = vector.load %arg11[%c4_53, %c128_54] : memref<16x256xf32, #tpu.memory_space<vmem>>, vector<4x64xf32>
    %c40 = arith.constant 40 : index
    %c0_55 = arith.constant 0 : index
    %54 = vector.load %arg12[%c40, %c0_55] : memref<72x64xf32, #tpu.memory_space<vmem>>, vector<4x64xf32>
    tpu.vector_store %arg12[%c40, %c0_55], %53 {strides = array<i32>} : memref<72x64xf32, #tpu.memory_space<vmem>>, vector<4x64xf32>,
    %c12_56 = arith.constant 12 : index
    %c127_57 = arith.constant 127 : index
    %55 = vector.load %arg11[%c12_56, %c127_57] : memref<16x256xf32, #tpu.memory_space<vmem>>, vector<4x64xf32>
    %c0_58 = arith.constant 0 : index
    %c0_59 = arith.constant 0 : index
    %56 = vector.load %arg5[%c0_58, %c0_59] : memref<3x64xf32, #tpu.memory_space<vmem>>, vector<1x64xf32>
    %57 = vector.broadcast %56 : vector<1x64xf32> to vector<4x64xf32>
    %58 = arith.mulf %55, %57 : vector<4x64xf32>
    %c48 = arith.constant 48 : index
    %c0_60 = arith.constant 0 : index
    %59 = vector.load %arg12[%c48, %c0_60] : memref<72x64xf32, #tpu.memory_space<vmem>>, vector<4x64xf32>
    tpu.vector_store %arg12[%c48, %c0_60], %58 {strides = array<i32>} : memref<72x64xf32, #tpu.memory_space<vmem>>, vector<4x64xf32>,
    %c8_61 = arith.constant 8 : index
    %c128_62 = arith.constant 128 : index
    %60 = vector.load %arg11[%c8_61, %c128_62] : memref<16x256xf32, #tpu.memory_space<vmem>>, vector<4x64xf32>
    %c56 = arith.constant 56 : index
    %c0_63 = arith.constant 0 : index
    %61 = vector.load %arg12[%c56, %c0_63] : memref<72x64xf32, #tpu.memory_space<vmem>>, vector<4x64xf32>
    tpu.vector_store %arg12[%c56, %c0_63], %60 {strides = array<i32>} : memref<72x64xf32, #tpu.memory_space<vmem>>, vector<4x64xf32>,
    %c12_64 = arith.constant 12 : index
    %c128_65 = arith.constant 128 : index
    %62 = vector.load %arg11[%c12_64, %c128_65] : memref<16x256xf32, #tpu.memory_space<vmem>>, vector<4x64xf32>
    %c64 = arith.constant 64 : index
    %c0_66 = arith.constant 0 : index
    %63 = vector.load %arg12[%c64, %c0_66] : memref<72x64xf32, #tpu.memory_space<vmem>>, vector<4x64xf32>
    tpu.vector_store %arg12[%c64, %c0_66], %62 {strides = array<i32>} : memref<72x64xf32, #tpu.memory_space<vmem>>, vector<4x64xf32>,
    %c0_67 = arith.constant 0 : index
    %c0_68 = arith.constant 0 : index
    %64 = vector.load %arg4[%c0_67, %c0_68] : memref<8x72xf32, #tpu.memory_space<vmem>>, vector<8x72xf32>
    %c0_69 = arith.constant 0 : index
    %c0_70 = arith.constant 0 : index
    %65 = vector.load %arg12[%c0_69, %c0_70] : memref<72x64xf32, #tpu.memory_space<vmem>>, vector<72x64xf32>
    %cst_71 = arith.constant dense<0.000000e+00> : vector<8x64xf32>
    %66 = tpu.matmul %64, %65, %cst_71 {dimension_numbers = #tpu.dot_dimension_numbers<[1], [0], [0], [1], [0, 0, 1, 1], [], []>} : vector<8x72xf32>, vector<72x64xf32>, vector<8x64xf32> -> vector<8x64xf32>
    %c0_72 = arith.constant 0 : index
    %c0_73 = arith.constant 0 : index
    %67 = vector.load %arg9[%c0_72, %c0_73] : memref<8x4xf32, #tpu.memory_space<vmem>>, vector<8x4xf32>
    %c0_74 = arith.constant 0 : index
    %c128_75 = arith.constant 128 : index
    %68 = vector.load %arg11[%c0_74, %c128_75] : memref<16x256xf32, #tpu.memory_space<vmem>>, vector<4x64xf32>
    %cst_76 = arith.constant dense<0.000000e+00> : vector<8x64xf32>
    %69 = tpu.matmul %67, %68, %cst_76 {dimension_numbers = #tpu.dot_dimension_numbers<[1], [0], [0], [1], [0, 0, 1, 1], [], []>} : vector<8x4xf32>, vector<4x64xf32>, vector<8x64xf32> -> vector<8x64xf32>
    %c0_77 = arith.constant 0 : index
    %c0_78 = arith.constant 0 : index
    %70 = vector.load %arg6[%c0_77, %c0_78] : memref<8x1xf32, #tpu.memory_space<vmem>>, vector<8x1xf32>
    %71 = vector.broadcast %70 : vector<8x1xf32> to vector<8x64xf32>
    %72 = arith.mulf %66, %71 : vector<8x64xf32>
    %c0_79 = arith.constant 0 : index
    %c0_80 = arith.constant 0 : index
    %73 = vector.load %arg7[%c0_79, %c0_80] : memref<8x1xf32, #tpu.memory_space<vmem>>, vector<8x1xf32>
    %74 = vector.broadcast %73 : vector<8x1xf32> to vector<8x64xf32>
    %75 = arith.addf %72, %74 : vector<8x64xf32>
    %cst_81 = arith.constant 0.000000e+00 : f32
    %76 = vector.broadcast %cst_81 : f32 to vector<8x64xf32>
    %77 = arith.maximumf %75, %76 : vector<8x64xf32>
    %c0_82 = arith.constant 0 : index
    %c128_83 = arith.constant 128 : index
    %78 = vector.load %arg13[%c0_82, %c128_83] : memref<8x256xf32, #tpu.memory_space<vmem>>, vector<8x64xf32>
    tpu.vector_store %arg13[%c0_82, %c128_83], %77 {strides = array<i32>} : memref<8x256xf32, #tpu.memory_space<vmem>>, vector<8x64xf32>,
    %c0_84 = arith.constant 0 : index
    %c119_85 = arith.constant 119 : index
    %79 = vector.load %arg13[%c0_84, %c119_85] : memref<8x256xf32, #tpu.memory_space<vmem>>, vector<8x64xf32>
    %c0_86 = arith.constant 0 : index
    %c0_87 = arith.constant 0 : index
    %80 = vector.load %arg5[%c0_86, %c0_87] : memref<3x64xf32, #tpu.memory_space<vmem>>, vector<1x64xf32>
    %81 = vector.broadcast %80 : vector<1x64xf32> to vector<8x64xf32>
    %82 = arith.mulf %79, %81 : vector<8x64xf32>
    %c0_88 = arith.constant 0 : index
    %c0_89 = arith.constant 0 : index
    %83 = vector.load %arg14[%c0_88, %c0_89] : memref<72x64xf32, #tpu.memory_space<vmem>>, vector<8x64xf32>
    tpu.vector_store %arg14[%c0_88, %c0_89], %82 {strides = array<i32>} : memref<72x64xf32, #tpu.memory_space<vmem>>, vector<8x64xf32>,
    %c0_90 = arith.constant 0 : index
    %c120_91 = arith.constant 120 : index
    %84 = vector.load %arg13[%c0_90, %c120_91] : memref<8x256xf32, #tpu.memory_space<vmem>>, vector<8x64xf32>
    %c8_92 = arith.constant 8 : index
    %c0_93 = arith.constant 0 : index
    %85 = vector.load %arg14[%c8_92, %c0_93] : memref<72x64xf32, #tpu.memory_space<vmem>>, vector<8x64xf32>
    tpu.vector_store %arg14[%c8_92, %c0_93], %84 {strides = array<i32>} : memref<72x64xf32, #tpu.memory_space<vmem>>, vector<8x64xf32>,
    %c0_94 = arith.constant 0 : index
    %c121 = arith.constant 121 : index
    %86 = vector.load %arg13[%c0_94, %c121] : memref<8x256xf32, #tpu.memory_space<vmem>>, vector<8x64xf32>
    %c2 = arith.constant 2 : index
    %c0_95 = arith.constant 0 : index
    %87 = vector.load %arg5[%c2, %c0_95] : memref<3x64xf32, #tpu.memory_space<vmem>>, vector<1x64xf32>
    %88 = vector.broadcast %87 : vector<1x64xf32> to vector<8x64xf32>
    %89 = arith.mulf %86, %88 : vector<8x64xf32>
    %c16_96 = arith.constant 16 : index
    %c0_97 = arith.constant 0 : index
    %90 = vector.load %arg14[%c16_96, %c0_97] : memref<72x64xf32, #tpu.memory_space<vmem>>, vector<8x64xf32>
    tpu.vector_store %arg14[%c16_96, %c0_97], %89 {strides = array<i32>} : memref<72x64xf32, #tpu.memory_space<vmem>>, vector<8x64xf32>,
    %c0_98 = arith.constant 0 : index
    %c127_99 = arith.constant 127 : index
    %91 = vector.load %arg13[%c0_98, %c127_99] : memref<8x256xf32, #tpu.memory_space<vmem>>, vector<8x64xf32>
    %c0_100 = arith.constant 0 : index
    %c0_101 = arith.constant 0 : index
    %92 = vector.load %arg5[%c0_100, %c0_101] : memref<3x64xf32, #tpu.memory_space<vmem>>, vector<1x64xf32>
    %93 = vector.broadcast %92 : vector<1x64xf32> to vector<8x64xf32>
    %94 = arith.mulf %91, %93 : vector<8x64xf32>
    %c24_102 = arith.constant 24 : index
    %c0_103 = arith.constant 0 : index
    %95 = vector.load %arg14[%c24_102, %c0_103] : memref<72x64xf32, #tpu.memory_space<vmem>>, vector<8x64xf32>
    tpu.vector_store %arg14[%c24_102, %c0_103], %94 {strides = array<i32>} : memref<72x64xf32, #tpu.memory_space<vmem>>, vector<8x64xf32>,
    %c0_104 = arith.constant 0 : index
    %c128_105 = arith.constant 128 : index
    %96 = vector.load %arg13[%c0_104, %c128_105] : memref<8x256xf32, #tpu.memory_space<vmem>>, vector<8x64xf32>
    %c32_106 = arith.constant 32 : index
    %c0_107 = arith.constant 0 : index
    %97 = vector.load %arg14[%c32_106, %c0_107] : memref<72x64xf32, #tpu.memory_space<vmem>>, vector<8x64xf32>
    tpu.vector_store %arg14[%c32_106, %c0_107], %96 {strides = array<i32>} : memref<72x64xf32, #tpu.memory_space<vmem>>, vector<8x64xf32>,
    %c0_108 = arith.constant 0 : index
    %c129 = arith.constant 129 : index
    %98 = vector.load %arg13[%c0_108, %c129] : memref<8x256xf32, #tpu.memory_space<vmem>>, vector<8x64xf32>
    %c2_109 = arith.constant 2 : index
    %c0_110 = arith.constant 0 : index
    %99 = vector.load %arg5[%c2_109, %c0_110] : memref<3x64xf32, #tpu.memory_space<vmem>>, vector<1x64xf32>
    %100 = vector.broadcast %99 : vector<1x64xf32> to vector<8x64xf32>
    %101 = arith.mulf %98, %100 : vector<8x64xf32>
    %c40_111 = arith.constant 40 : index
    %c0_112 = arith.constant 0 : index
    %102 = vector.load %arg14[%c40_111, %c0_112] : memref<72x64xf32, #tpu.memory_space<vmem>>, vector<8x64xf32>
    tpu.vector_store %arg14[%c40_111, %c0_112], %101 {strides = array<i32>} : memref<72x64xf32, #tpu.memory_space<vmem>>, vector<8x64xf32>,
    %c0_113 = arith.constant 0 : index
    %c135 = arith.constant 135 : index
    %103 = vector.load %arg13[%c0_113, %c135] : memref<8x256xf32, #tpu.memory_space<vmem>>, vector<8x64xf32>
    %c0_114 = arith.constant 0 : index
    %c0_115 = arith.constant 0 : index
    %104 = vector.load %arg5[%c0_114, %c0_115] : memref<3x64xf32, #tpu.memory_space<vmem>>, vector<1x64xf32>
    %105 = vector.broadcast %104 : vector<1x64xf32> to vector<8x64xf32>
    %106 = arith.mulf %103, %105 : vector<8x64xf32>
    %c48_116 = arith.constant 48 : index
    %c0_117 = arith.constant 0 : index
    %107 = vector.load %arg14[%c48_116, %c0_117] : memref<72x64xf32, #tpu.memory_space<vmem>>, vector<8x64xf32>
    tpu.vector_store %arg14[%c48_116, %c0_117], %106 {strides = array<i32>} : memref<72x64xf32, #tpu.memory_space<vmem>>, vector<8x64xf32>,
    %c0_118 = arith.constant 0 : index
    %c136 = arith.constant 136 : index
    %108 = vector.load %arg13[%c0_118, %c136] : memref<8x256xf32, #tpu.memory_space<vmem>>, vector<8x64xf32>
    %c56_119 = arith.constant 56 : index
    %c0_120 = arith.constant 0 : index
    %109 = vector.load %arg14[%c56_119, %c0_120] : memref<72x64xf32, #tpu.memory_space<vmem>>, vector<8x64xf32>
    tpu.vector_store %arg14[%c56_119, %c0_120], %108 {strides = array<i32>} : memref<72x64xf32, #tpu.memory_space<vmem>>, vector<8x64xf32>,
    %c0_121 = arith.constant 0 : index
    %c137 = arith.constant 137 : index
    %110 = vector.load %arg13[%c0_121, %c137] : memref<8x256xf32, #tpu.memory_space<vmem>>, vector<8x64xf32>
    %c2_122 = arith.constant 2 : index
    %c0_123 = arith.constant 0 : index
    %111 = vector.load %arg5[%c2_122, %c0_123] : memref<3x64xf32, #tpu.memory_space<vmem>>, vector<1x64xf32>
    %112 = vector.broadcast %111 : vector<1x64xf32> to vector<8x64xf32>
    %113 = arith.mulf %110, %112 : vector<8x64xf32>
    %c64_124 = arith.constant 64 : index
    %c0_125 = arith.constant 0 : index
    %114 = vector.load %arg14[%c64_124, %c0_125] : memref<72x64xf32, #tpu.memory_space<vmem>>, vector<8x64xf32>
    tpu.vector_store %arg14[%c64_124, %c0_125], %113 {strides = array<i32>} : memref<72x64xf32, #tpu.memory_space<vmem>>, vector<8x64xf32>,
    %c0_126 = arith.constant 0 : index
    %c0_127 = arith.constant 0 : index
    %115 = vector.load %arg8[%c0_126, %c0_127] : memref<8x72xf32, #tpu.memory_space<vmem>>, vector<8x72xf32>
    %c0_128 = arith.constant 0 : index
    %c0_129 = arith.constant 0 : index
    %116 = vector.load %arg14[%c0_128, %c0_129] : memref<72x64xf32, #tpu.memory_space<vmem>>, vector<72x64xf32>
    %cst_130 = arith.constant dense<0.000000e+00> : vector<8x64xf32>
    %117 = tpu.matmul %115, %116, %cst_130 {dimension_numbers = #tpu.dot_dimension_numbers<[1], [0], [0], [1], [0, 0, 1, 1], [], []>} : vector<8x72xf32>, vector<72x64xf32>, vector<8x64xf32> -> vector<8x64xf32>
    %118 = arith.addf %69, %117 : vector<8x64xf32>
    %119 = vector.shape_cast %118 : vector<8x64xf32> to vector<1x8x64xf32>
    %c0_131 = arith.constant 0 : index
    %c0_132 = arith.constant 0 : index
    %c0_133 = arith.constant 0 : index
    %120 = vector.load %arg10[%c0_131, %c0_132, %c0_133] : memref<1x8x64xf32, #tpu.memory_space<vmem>>, vector<1x8x64xf32>
    tpu.vector_store %arg10[%c0_131, %c0_132, %c0_133], %119 {strides = array<i32>} : memref<1x8x64xf32, #tpu.memory_space<vmem>>, vector<1x8x64xf32>,
    return
  }
  func.func @transform_0(%arg0: i32) -> (i32, i32, i32) {
    %c0_i32 = arith.constant 0 : i32
    %c0_i32_0 = arith.constant 0 : i32
    %c0_i32_1 = arith.constant 0 : i32
    return %arg0, %c0_i32, %c0_i32_0 : i32, i32, i32
  }
  func.func @transform_1(%arg0: i32) -> (i32, i32) {
    %c0_i32 = arith.constant 0 : i32
    %c0_i32_0 = arith.constant 0 : i32
    %c0_i32_1 = arith.constant 0 : i32
    return %c0_i32, %c0_i32_0 : i32, i32
  }
  func.func @transform_2(%arg0: i32) -> (i32, i32) {
    %c0_i32 = arith.constant 0 : i32
    %c0_i32_0 = arith.constant 0 : i32
    %c0_i32_1 = arith.constant 0 : i32
    return %c0_i32, %c0_i32_0 : i32, i32
  }
  func.func @transform_3(%arg0: i32) -> (i32, i32) {
    %c0_i32 = arith.constant 0 : i32
    %c0_i32_0 = arith.constant 0 : i32
    %c0_i32_1 = arith.constant 0 : i32
    return %c0_i32, %c0_i32_0 : i32, i32
  }
  func.func @transform_4(%arg0: i32) -> (i32, i32) {
    %c0_i32 = arith.constant 0 : i32
    %c0_i32_0 = arith.constant 0 : i32
    %c0_i32_1 = arith.constant 0 : i32
    return %c0_i32, %c0_i32_0 : i32, i32
  }
  func.func @transform_5(%arg0: i32) -> (i32, i32) {
    %c0_i32 = arith.constant 0 : i32
    %c0_i32_0 = arith.constant 0 : i32
    %c0_i32_1 = arith.constant 0 : i32
    return %c0_i32, %c0_i32_0 : i32, i32
  }
  func.func @transform_6(%arg0: i32) -> (i32, i32) {
    %c0_i32 = arith.constant 0 : i32
    %c0_i32_0 = arith.constant 0 : i32
    %c0_i32_1 = arith.constant 0 : i32
    return %c0_i32, %c0_i32_0 : i32, i32
  }
  func.func @transform_7(%arg0: i32) -> (i32, i32) {
    %c0_i32 = arith.constant 0 : i32
    %c0_i32_0 = arith.constant 0 : i32
    %c0_i32_1 = arith.constant 0 : i32
    return %c0_i32, %c0_i32_0 : i32, i32
  }
  func.func @transform_8(%arg0: i32) -> (i32, i32) {
    %c0_i32 = arith.constant 0 : i32
    %c0_i32_0 = arith.constant 0 : i32
    %c0_i32_1 = arith.constant 0 : i32
    return %c0_i32, %c0_i32_0 : i32, i32
  }
  func.func @transform_9(%arg0: i32) -> (i32, i32, i32) {
    %c0_i32 = arith.constant 0 : i32
    %c0_i32_0 = arith.constant 0 : i32
    %c0_i32_1 = arith.constant 0 : i32
    return %arg0, %c0_i32, %c0_i32_0 : i32, i32, i32
  }
}

</mosaic_0001>

<bundles_post_ra>
// kernel: tile.0
= control target key start
LH: loop header
LB: loop body
LE: loop exit
PB: predicated region body
PF: predicated region fallthrough
CT: control target
= control target key end

     0   :  { %s34_s8 = smov 125   ;;  %s35_s9 = smov 126   ;;  %vm7_vm0 = vcmask 7168   ;;  %s61_s0 = inlined_call_operand.vmem [shape: f32[4,4], index: 0, kind: input, shape index: {}]   ;;  %s62_s1 = inlined_call_operand.vmem [shape: f32[16,1], index: 1, kind: output, shape index: {}]  }
   0x1   :  { %v4_v0 = vld [vmem:[%s61_s0] sm:$0xf]  ;;  %s33_s0 = smov 127  }
   0x2   :  { %5 = vst [vmem:[#allocation0] sm:$0xf] %v4_v0 }
   0x9   :  { %v9_v1 = vld [vmem:[#allocation0] sm:$0xf]  }
   0xa   :  { %v21_v2 = vld [vmem:[#allocation0] sm:$0xf]   ;;  %10 = vrot.lane.b32.xlu0 %v9_v1, %s33_s0 }
   0xb   :  { %22 = vrot.lane.b32.xlu1 %v21_v2, %s34_s8  ;;  %v15_v3 = vld [vmem:[#allocation0] sm:$0xf]  }
   0xc   :  { %v6_v4 = vld [vmem:[#allocation0] sm:$0xf]  }
   0xd   :  { %8 = vst.msk [vmem:[%s62_s1] ss:$4 sm:$0xf] %vm7_vm0, %v6_v4  }
  0x12   :  { %16 = vrot.lane.b32.xlu0 %v15_v3, %s35_s9 }
  0x7c   :  { %v11_v5 = vpop.permute.xlu0 %10  }
  0x7d   :  { %v23_v6 = vpop.permute.xlu1 %22   ;;  %27 = vst.msk [vmem:[%s62_s1 + $0x1] ss:$4 sm:$0xf] %vm7_vm0, %v11_v5  }
  0x7e   :  { %29 = vst.msk [vmem:[%s62_s1 + $0x3] ss:$4 sm:$0xf] %vm7_vm0, %v23_v6  }
  0x84   :  { %v17_v7 = vpop.permute.xlu0 %16  }
  0x85   :  { %28 = vst.msk [vmem:[%s62_s1 + $0x2] ss:$4 sm:$0xf] %vm7_vm0, %v17_v7  }

// kernel: tile.13
= control target key start
LH: loop header
LB: loop body
LE: loop exit
PB: predicated region body
PF: predicated region fallthrough
CT: control target
= control target key end

     0   :  { %s22_s0 = inlined_call_operand.vmem [shape: f32[4], index: 0, kind: input, shape index: {}]   ;;  %s23_s1 = inlined_call_operand.vmem [shape: f32[4,4], index: 1, kind: output, shape index: {}]  }
   0x1   :  { %v4_v0 = vld [vmem:[%s22_s0] ss:$0 sm:$0xff] }
   0x2   :  { %5 = vst [vmem:[%s23_s1] sm:$0xf] %v4_v0 }

// kernel: basic_block_pallas.1
= control target key start
LH: loop header
LB: loop body
LE: loop exit
PB: predicated region body
PF: predicated region fallthrough
CT: control target
= control target key end

     0   :  { %s875_s30 = smov 0   ;;  %s1039_s0 = inlined_call_operand.vmem [shape: f32[2,16,64], index: 0, kind: input, shape index: {}]   ;;  %s1040_s1 = inlined_call_operand.vmem [shape: f32[16,1], index: 1, kind: input, shape index: {}]   ;;  %s1041_s2 = inlined_call_operand.vmem [shape: f32[16,1], index: 2, kind: input, shape index: {}]   ;;  %s1042_s3 = inlined_call_operand.vmem [shape: f32[8,72], index: 3, kind: input, shape index: {}]   ;;  %s1043_s4 = inlined_call_operand.vmem [shape: f32[3,64], index: 4, kind: input, shape index: {}]   ;;  %s1044_s5 = inlined_call_operand.vmem [shape: f32[8,1], index: 5, kind: input, shape index: {}]   ;;  %s1045_s6 = inlined_call_operand.vmem [shape: f32[8,1], index: 6, kind: input, shape index: {}]   ;;  %s1046_s7 = inlined_call_operand.vmem [shape: f32[8,72], index: 7, kind: input, shape index: {}]   ;;  %s1047_s8 = inlined_call_operand.vmem [shape: f32[8,4], index: 8, kind: input, shape index: {}]   ;;  %s1048_s9 = inlined_call_operand.vmem [shape: f32[2,8,64], index: 9, kind: output, shape index: {}]  }
   0x1 LB: > { %s757_s10 = sadd.s32 4294967295, %s813_s30   ;;  %p761_p0 = scmp.ge.s32.totalorder %s813_s30, 1  ;;  %s813_s30 = sphi %s875_s30, %s19_s30  }
   0x2   : > { %p287_p1 = scmp.lt.s32.totalorder %s813_s30, 3 }
   0x4   : > { %p288_p2 = pnand %p761_p0, %p287_p1 }
   0x5   : > { %s816_s17 = smov (!%p288_p2), 127   ;;  %s817_s26 = smov (!%p288_p2), 119  }
   0x6   : > { %291 = sbr.rel (%p288_p2) target bundleno = 700 (0x2bc), region = 56  ;;  %s819_s27 = smov (!%p288_p2), 1  }
   0x7   : > { %p322_p3 = scmp.lt.s32.totalorder (!%p288_p2), %s757_s10, 1  ;;  %s820_s13 = smov (!%p288_p2), 8  }
   0x8   : > { %s821_s14 = smov (!%p288_p2), 9   ;;  %s822_s24 = smov (!%p288_p2), 7  }
   0x9   : > { %s823_s16 = smov (!%p288_p2), 121   ;;  %s824_s22 = smov (!%p288_p2), 120  }
   0xb   : > { %v351_v0 = vld [vmem:[%s1040_s1 + $0x8] sm:$0xff]  ;;  %v350_v1 = vld [vmem:[%s1040_s1] sm:$0xff]  ;;  %v815_v2 = vmov 0   ;;  %v818_v8 = vmov 0.0   ;;  %vm333_vm0 = vcmask 1048064   ;;  %vm338_vm1 = vcmask 519168  }
   0xc   : > { %791 = vset.pattern.permute.xlu1 %v815_v2  ;;  %790 = vset.pattern.permute.xlu0 %v815_v2  ;;  %v798_v3 = vld [vmem:[%s1043_s4] ss:$0 sm:$0xff]  ;;  %v365_v4 = vld [vmem:[%s1041_s2 + $0x8] sm:$0xff]  ;;  %332 = vst [vmem:[#allocation2 + $0x10] sm:$0xff] %v818_v8  ;;  %s1050_s10 = smov (!%p322_p3, %s757_s10), 1  ;;  %vm380_vm2 = vcmask 523264  }
   0xd   : > { %359 = vperm.xlu0 %790, %v351_v0   ;;  %354 = vperm.xlu1 %791, %v350_v1   ;;  %v364_v5 = vld [vmem:[%s1041_s2] sm:$0xff]  ;;  %331 = vst [vmem:[#allocation2] sm:$0xff] %v818_v8  ;;  %s771_s28 = sshll.u32 %s1050_s10, 4  ;;  %vm679_vm3 = vcmask 1043456   ;;  %vm402_vm4 = vcmask 523268   ;;  %vm443_vm5 = vcmask 7168  }
   0xe   : > { %456 = vrot.lane.b32.xlu2 %v798_v3, %s816_s17  ;;  %v800_v6 = vld [vmem:[%s1043_s4] ss:$0 sm:$0xff]  ;;  %335 = vst.msk [vmem:[#allocation2 + $0x18] sm:$0xff] %vm333_vm0, %v818_v8  ;;  %s326_s12 = scalar_lea.vmem %s1039_s0, %s771_s28  ;;  %v801_v56 = vld [vmem:[%s1043_s4 + $0x2] ss:$0 sm:$0xff]  ;;  %vm412_vm6 = vcmask 64512  }
   0xf   : > { %797 = vset.pattern.permute.xlu2 %v815_v2  ;;  %v799_v7 = vld [vmem:[%s1043_s4] ss:$0 sm:$0xff]  ;;  %334 = vst.msk [vmem:[#allocation2 + $0x8] sm:$0xff] %vm333_vm0, %v818_v8  ;;  %v349_v17 = vld [vmem:[%s326_s12 + $0x8] sm:$0xff]  ;;  %v804_v62 = vld [vmem:[%s1043_s4 + $0x2] ss:$0 sm:$0xff] }
  0x10   : > { %337 = vst.msk [vmem:[#allocation4 + $0x8] sm:$0xff] %vm333_vm0, %v818_v8  ;;  %v348_v18 = vld [vmem:[%s326_s12] sm:$0xff]  ;;  %vm399_vm7 = vcmask 72704   ;;  %vm484_vm8 = vcmask 588800   ;;  %vm675_vm9 = vcmask 31744   ;;  %vm572_vm10 = vcmask 56320  }
  0x11   : > { %347 = vst.msk [vmem:[#allocation3 + $0x44] sm:$0xf] %vm338_vm1, %v818_v8  ;;  %v510_v48 = vld [vmem:[%s1044_s5] sm:$0xff] }
  0x12   : > { %339 = vst.msk [vmem:[#allocation3 + $0x4] sm:$0xf] %vm338_vm1, %v818_v8  ;;  %v803_v57 = vld [vmem:[%s1043_s4] ss:$0 sm:$0xff]  ;;  %v805_v63 = vld [vmem:[%s1043_s4 + $0x2] ss:$0 sm:$0xff] }
  0x13   : > { %v451_v9 = vld [vmem:[#allocation2 + $0x10] sm:$0xf0]  ;;  %340 = vst.msk [vmem:[#allocation3 + $0xc] sm:$0xf] %vm338_vm1, %v818_v8  ;;  %v404_v35 = vld [vmem:[#allocation2 + $0x10] sm:$0xf] }
  0x14   : > { %v427_v12 = vld [vmem:[#allocation2] sm:$0xf0]  ;;  %341 = vst.msk [vmem:[#allocation3 + $0x14] sm:$0xf] %vm338_vm1, %v818_v8  ;;  %v416_v40 = vld [vmem:[#allocation2 + $0x10] sm:$0xf0] }
  0x15   : > { %373 = vperm.xlu0 %790, %v365_v4   ;;  %368 = vperm.xlu1 %791, %v364_v5   ;;  %342 = vst.msk [vmem:[#allocation3 + $0x1c] sm:$0xf] %vm338_vm1, %v818_v8  ;;  %v792_v42 = vpack.i.bf16 %v404_v35, %v416_v40  ;;  %v383_v46 = vld [vmem:[#allocation2 + $0x10] sm:$0xf0]  ;;  %v517_v58 = vld [vmem:[%s1045_s6] sm:$0xff] }
  0x16   : > { %432 = vrot.lane.b32.xlu2 %v800_v6, %s816_s17  ;;  %343 = vst.msk [vmem:[#allocation3 + $0x24] sm:$0xf] %vm338_vm1, %v818_v8  ;;  %v802_v61 = vld [vmem:[%s1043_s4] ss:$0 sm:$0xff] }
  0x17   : > { %344 = vst.msk [vmem:[#allocation3 + $0x2c] sm:$0xf] %vm338_vm1, %v818_v8  ;;  %v806_v4 = vld [vmem:[%s1043_s4] ss:$0 sm:$0xff] }
  0x18   : > { %345 = vst.msk [vmem:[#allocation3 + $0x34] sm:$0xf] %vm338_vm1, %v818_v8 }
  0x19   : > { %346 = vst.msk [vmem:[#allocation3 + $0x3c] sm:$0xf] %vm338_vm1, %v818_v8 }
  0x1d   : > { %388 = vrot.lane.b32.xlu0 %v799_v7, %s817_s26 }
  0x68   : > { %v457_v10 = vpop.permute.xlu2 %456 }
  0x69   : > { %v459_v11 = vmul.f32 %v457_v10, %v451_v9 }
  0x6b   : > { %463 = vrot.lane.b32.xlu1 %v459_v11, %s819_s27 }
  0x70   : > { %v433_v13 = vpop.permute.xlu2 %432 }
  0x71   : > { %v435_v14 = vmul.f32 %v433_v13, %v427_v12 }
  0x73   : > { %439 = vrot.lane.b32.xlu0 %v435_v14, %s819_s27 }
  0x7f   : > { %v360_v15 = vpop.permute.xlu0 %359  ;;  %v355_v16 = vpop.permute.xlu1 %354 }
  0x80   : > { %v363_v19 = vmul.f32 %v360_v15, %v349_v17  ;;  %v362_v20 = vmul.f32 %v355_v16, %v348_v18  ;;  %v474_v15 = vld [vmem:[%s1042_s3] sm:$0xff] }
  0x87   : > { %v374_v21 = vpop.permute.xlu0 %373  ;;  %v369_v22 = vpop.permute.xlu1 %368 }
  0x88   : > { %v377_v23 = vadd.f32 %v374_v21, %v363_v19  ;;  %v376_v24 = vadd.f32 %v369_v22, %v362_v20 }
  0x8a   : > { %v379_v25 = vmax.f32 %v377_v23, 0.0  ;;  %v378_v26 = vmax.f32 %v376_v24, 0.0 }
  0x8c   : > { %382 = vst.msk [vmem:[#allocation2 + $0x18] sm:$0xff] %vm380_vm2, %v379_v25 }
  0x8d   : > { %381 = vst.msk [vmem:[#allocation2 + $0x8] sm:$0xff] %vm380_vm2, %v378_v26 }
  0x8f   : > { %v389_v38 = vpop.permute.xlu0 %388 }
  0x90   : > { %v391_v47 = vmul.f32 %v389_v38, %v383_v46 }
  0x93   : > { %v417_v27 = vld [vmem:[#allocation2 + $0x18] sm:$0xf0]  ;;  %v470_v34 = vld [vmem:[#allocation2 + $0x18] sm:$0xf] }
  0x94   : > { %v452_v28 = vld [vmem:[#allocation2 + $0x18] sm:$0xf0]  ;;  %v428_v29 = vld [vmem:[#allocation2 + $0x8] sm:$0xf0]  ;;  %422 = vrot.lane.b32.xlu0 %v417_v27, %s820_s13  ;;  %v509_v30 = vld [vmem:[#allocation2 + $0x8] sm:$0xf] }
  0x95   : > { %v460_v31 = vmul.f32 %v457_v10, %v452_v28  ;;  %v472_v32 = vld [vmem:[#allocation2 + $0x18] sm:$0xf0]  ;;  %v436_v33 = vmul.f32 %v433_v13, %v428_v29  ;;  %767 = vmatpush.msk.msra.mxu2 %vm679_vm3, %v509_v30  ;;  %471 = vst.msk [vmem:[#allocation3 + $0x38] sm:$0xf] %vm338_vm1, %v470_v34  ;;  %v449_v36 = vld [vmem:[#allocation2 + $0x8] sm:$0xf0] }
  0x96   : > { %473 = vst.msk [vmem:[#allocation3 + $0x3c] sm:$0xf0] %vm402_vm4, %v472_v32  ;;  %v447_v37 = vld [vmem:[#allocation2 + $0x8] sm:$0xf]  ;;  %v384_v39 = vld [vmem:[#allocation2 + $0x18] sm:$0xf0] }
  0x97   : > { %465 = vrot.lane.b32.xlu2 %v460_v31, %s819_s27  ;;  %441 = vrot.lane.b32.xlu1 %v436_v33, %s819_s27  ;;  %450 = vst.msk [vmem:[#allocation3 + $0x24] sm:$0xf0] %vm402_vm4, %v449_v36  ;;  %v392_v41 = vmul.f32 %v389_v38, %v384_v39  ;;  %v405_v45 = vld [vmem:[#allocation2 + $0x18] sm:$0xf] }
  0x98   : > { %448 = vst.msk [vmem:[#allocation3 + $0x20] sm:$0xf] %vm338_vm1, %v447_v37 }
  0x9c   : > { %397 = vrot.lane.b32.xlu0 %v392_v41, %s821_s14  ;;  %v482_v44 = vld [vmem:[#allocation3 + $0x38] sm:$0xff] }
  0x9d   : > { %v483_v43 = vld [vmem:[#allocation3 + $0x40] sm:$0xff] }
  0x9e   : > { %495 = vmatpush.msra.mxu0 %v483_v43  ;;  %v480_v53 = vld [vmem:[#allocation3 + $0x28] sm:$0xff] }
  0x9f   : > { %793 = vrot.lane.b32.xlu2 %v792_v42, %s820_s13  ;;  %410 = vrot.lane.b32.xlu1 %v405_v45, %s820_s13  ;;  %v479_v55 = vld [vmem:[#allocation3 + $0x20] sm:$0xff] }
  0xa0   : > { %496 = vmatpush.msra.mxu0 %v482_v44  ;;  %v508_v44 = vld [vmem:[%s1047_s8] sm:$0xff] }
  0xa1   : > { %768 = vmatmul.msk.f32.vlgmr.msra.gmra.mxu2 %vm675_vm9, %v508_v44 }
  0xa4   : > { %633 = vrot.lane.b32.xlu0 %v801_v56, %s821_s14 }
  0xa7   : > { %395 = vrot.lane.b32.xlu2 %v391_v47, %s821_s14  ;;  %513 = vperm.xlu1 %791, %v510_v48  }
  0xac   : > { %581 = vrot.lane.b32.xlu0 %v802_v61, %s816_s17 }
  0xaf   : > { %614 = vrot.lane.b32.xlu1 %v803_v57, %s822_s24  ;;  %520 = vperm.xlu2 %797, %v517_v58  }
  0xb7   : > { %561 = vrot.lane.b32.xlu1 %v804_v62, %s823_s16  ;;  %601 = vrot.lane.b32.xlu2 %v805_v63, %s819_s27  ;;  %v642_v63 = vld [vmem:[%s1046_s7] sm:$0xff] }
  0xbf   : > { %531 = vrot.lane.b32.xlu2 %v806_v4, %s817_s26 }
  0xc7   : > { %549 = vrot.lane.b32.xlu2 %v818_v8, %s820_s13 }
  0xdd   : > { %v464_v49 = vpop.permute.xlu1 %463 }
  0xe5   : > { %v440_v54 = vpop.permute.xlu0 %439 }
  0xf1   : > { %v466_v50 = vpop.permute.xlu2 %465 }
  0xf2   : > { %v467_v51 = vsel %vm443_vm5, %v464_v49, %v466_v50 }
  0xf3   : > { %469 = vst.msk [vmem:[#allocation3 + $0x2c] sm:$0xf0] %vm402_vm4, %v467_v51 }
  0xf9   : > { %v794_v59 = vpop.permute.xlu2 %793 }
  0xfa   : > { %v481_v52 = vld [vmem:[#allocation3 + $0x30] sm:$0xff]  ;;  %v795_v60 = vunpack.i.l.bf16 %v794_v59  ;;  %v796_v9 = vunpack.i.h.bf16 %v794_v59 }
  0xfb   : > { %497 = vmatpush.msra.mxu0 %v481_v52 }
  0xfd   : > { %498 = vmatpush.msra.mxu0 %v480_v53 }
  0xff   : > { %499 = vmatpush.msra.mxu0 %v479_v55 }
 0x101   : > { %v396_v5 = vpop.permute.xlu2 %395 }
 0x106   : > { %v423_v0 = vpop.permute.xlu0 %422 }
 0x107   : > { %v424_v1 = vsel %vm412_vm6, %v795_v60, %v423_v0 }
 0x108   : > { %426 = vst.msk [vmem:[#allocation3 + $0xc] sm:$0xf0] %vm402_vm4, %v424_v1 }
 0x109   : > { %v442_v2 = vpop.permute.xlu1 %441  ;;  %v521_v25 = vpop.permute.xlu2 %520 }
 0x10a   : > { %v444_v3 = vsel %vm443_vm5, %v440_v54, %v442_v2 }
 0x10b   : > { %446 = vst.msk [vmem:[#allocation3 + $0x14] sm:$0xf0] %vm402_vm4, %v444_v3 }
 0x10e   : > { %v398_v6 = vpop.permute.xlu0 %397 }
 0x10f   : > { %v400_v7 = vsel %vm399_vm7, %v396_v5, %v398_v6  ;;  %v477_v13 = vld [vmem:[#allocation3 + $0x10] sm:$0xff] }
 0x110   : > { %403 = vst.msk [vmem:[#allocation3 - $0x4] sm:$0xf0] %vm402_vm4, %v400_v7 }
 0x111   : > { %v411_v10 = vpop.permute.xlu1 %410  ;;  %v602_v30 = vpop.permute.xlu2 %601 }
 0x112   : > { %v413_v11 = vsel %vm412_vm6, %v796_v9, %v411_v10  ;;  %v478_v12 = vld [vmem:[#allocation3 + $0x18] sm:$0xff] }
 0x113   : > { %415 = vst.msk [vmem:[#allocation3 + $0x8] sm:$0xf] %vm338_vm1, %v413_v11  ;;  %500 = vmatpush.msra.mxu0 %v478_v12 }
 0x115   : > { %501 = vmatpush.msra.mxu0 %v477_v13 }
 0x116   : > { %v634_v18 = vpop.permute.xlu0 %633 }
 0x117   : > { %v475_v16 = vld [vmem:[#allocation3] sm:$0xff] }
 0x119   : > { %v514_v17 = vpop.permute.xlu1 %513  ;;  %v532_v35 = vpop.permute.xlu2 %531 }
 0x11a   : > { %v476_v14 = vld [vmem:[#allocation3 + $0x8] sm:$0xff]  ;;  %v534_v36 = vmul.f32 0.0, %v532_v35 }
 0x11b   : > { %502 = vmatpush.msra.mxu0 %v476_v14 }
 0x11d   : > { %503 = vmatpush.msra.mxu0 %v475_v16 }
 0x11e   : > { %765 = vmatmul.msk.f32.vlgmr.msra.gmra.mxu0 %vm484_vm8, %v474_v15  ;;  %v582_v19 = vpop.permute.xlu0 %581 }
 0x11f   : > { %v584_v21 = vmul.f32 0.0, %v582_v19 }
 0x121   : > { %v615_v20 = vpop.permute.xlu1 %614  ;;  %588 = vrot.lane.b32.xlu1 %v584_v21, %s819_s27  ;;  %v550_v38 = vpop.permute.xlu2 %549 }
 0x124   : > { %v700_v1 = vpop.f32.mrf.mxu2 }
 0x129   : > { %v562_v22 = vpop.permute.xlu1 %561 }
 0x12a   : > { %v564_v8 = vmul.f32 0.0, %v562_v22 }
 0x12c   : > { %568 = vrot.lane.b32.xlu0 %v564_v8, %s822_s24 }
 0x193   : > { %v589_v40 = vpop.permute.xlu1 %588 }
 0x19b   : > { %v505_v23 = vpop.f32.mrf.mxu0 }
 0x19c   : > { %v516_v24 = vmul.f32 %v514_v17, %v505_v23 }
 0x19e   : > { %v523_v26 = vadd.f32 %v521_v25, %v516_v24  ;;  %v569_v43 = vpop.permute.xlu0 %568 }
 0x1a0   : > { %v524_v27 = vmax.f32 %v523_v26, 0.0 }
 0x1a2   : > { %525 = vst.msk [vmem:[#allocation4 + $0x8] sm:$0xff] %vm380_vm2, %v524_v27 }
 0x1a9   : > { %v597_v28 = vld [vmem:[#allocation4 + $0x8] sm:$0xff] }
 0x1aa   : > { %625 = vrot.lane.b32.xlu1 %v597_v28, %s824_s22  ;;  %v617_v29 = vmul.f32 %v615_v20, %v597_v28  ;;  %v636_v31 = vmul.f32 %v634_v18, %v597_v28  ;;  %596 = vst.msk [vmem:[#allocation5 + $0x20] sm:$0xff] %vm380_vm2, %v597_v28  ;;  %v565_v32 = vmul.f32 %v597_v28, %v562_v22 }
 0x1ab   : > { %v585_v33 = vmul.f32 %v597_v28, %v582_v19  ;;  %v604_v34 = vmul.f32 %v602_v30, %v597_v28  ;;  %v535_v37 = vmul.f32 %v597_v28, %v532_v35 }
 0x1ac   : > { %619 = vrot.lane.b32.xlu2 %v617_v29, %s823_s16  ;;  %638 = vrot.lane.b32.xlu0 %v636_v31, %s817_s26 }
 0x1b1   : > { %v647_v59 = vld [vmem:[#allocation5 + $0x20] sm:$0xff] }
 0x1b2   : > { %570 = vrot.lane.b32.xlu1 %v565_v32, %s822_s24 }
 0x1b4   : > { %590 = vrot.lane.b32.xlu2 %v585_v33, %s819_s27  ;;  %606 = vrot.lane.b32.xlu0 %v604_v34, %s816_s17 }
 0x1ba   : > { %538 = vrot.lane.b32.xlu1 %v534_v36, %s821_s14 }
 0x1bc   : > { %540 = vrot.lane.b32.xlu2 %v535_v37, %s821_s14  ;;  %551 = vrot.lane.b32.xlu0 %v597_v28, %s820_s13  ;;  %s764_s14 = sshll.u32 %s1050_s10, 3 }
 0x1bd   : > { %s330_s25 = scalar_lea.vmem %s1048_s9, %s764_s14 }
 0x206   : > { %v620_v39 = vpop.permute.xlu2 %619 }
 0x207   : > { %622 = vst.msk [vmem:[#allocation5 + $0x30] sm:$0xff] %vm380_vm2, %v620_v39 }
 0x20e   : > { %v591_v41 = vpop.permute.xlu2 %590  ;;  %v649_v52 = vld [vmem:[#allocation5 + $0x30] sm:$0xff] }
 0x20f   : > { %v592_v42 = vsel %vm443_vm5, %v589_v40, %v591_v41 }
 0x210   : > { %594 = vst.msk [vmem:[#allocation5 + $0x18] sm:$0xff] %vm380_vm2, %v592_v42 }
 0x216   : > { %v541_v53 = vpop.permute.xlu2 %540 }
 0x217   : > { %v646_v60 = vld [vmem:[#allocation5 + $0x18] sm:$0xff] }
 0x21c   : > { %v626_v45 = vpop.permute.xlu1 %625 }
 0x21d   : > { %628 = vst.msk [vmem:[#allocation5 + $0x38] sm:$0xff] %vm380_vm2, %v626_v45 }
 0x21e   : > { %v639_v46 = vpop.permute.xlu0 %638 }
 0x21f   : > { %641 = vst.msk [vmem:[#allocation5 + $0x40] sm:$0xff] %vm380_vm2, %v639_v46 }
 0x224   : > { %v571_v47 = vpop.permute.xlu1 %570  ;;  %v650_v51 = vld [vmem:[#allocation5 + $0x38] sm:$0xff] }
 0x225   : > { %v573_v48 = vsel %vm572_vm10, %v569_v43, %v571_v47 }
 0x226   : > { %575 = vst.msk [vmem:[#allocation5 + $0x10] sm:$0xff] %vm380_vm2, %v573_v48  ;;  %v607_v49 = vpop.permute.xlu0 %606  ;;  %v651_v50 = vld [vmem:[#allocation5 + $0x40] sm:$0xff] }
 0x227   : > { %609 = vst.msk [vmem:[#allocation5 + $0x28] sm:$0xff] %vm380_vm2, %v607_v49  ;;  %662 = vmatpush.msra.mxu1 %v651_v50 }
 0x229   : > { %663 = vmatpush.msra.mxu1 %v650_v51 }
 0x22b   : > { %664 = vmatpush.msra.mxu1 %v649_v52 }
 0x22c   : > { %v539_v54 = vpop.permute.xlu1 %538 }
 0x22d   : > { %v542_v55 = vsel %vm399_vm7, %v539_v54, %v541_v53  ;;  %v645_v61 = vld [vmem:[#allocation5 + $0x10] sm:$0xff] }
 0x22e   : > { %544 = vst.msk [vmem:[#allocation5] sm:$0xff] %vm380_vm2, %v542_v55  ;;  %v552_v56 = vpop.permute.xlu0 %551  ;;  %v648_v57 = vld [vmem:[#allocation5 + $0x28] sm:$0xff] }
 0x22f   : > { %v553_v58 = vsel %vm412_vm6, %v550_v38, %v552_v56  ;;  %665 = vmatpush.msra.mxu1 %v648_v57 }
 0x230   : > { %555 = vst.msk [vmem:[#allocation5 + $0x8] sm:$0xff] %vm380_vm2, %v553_v58 }
 0x231   : > { %666 = vmatpush.msra.mxu1 %v647_v59 }
 0x233   : > { %667 = vmatpush.msra.mxu1 %v646_v60 }
 0x235   : > { %668 = vmatpush.msra.mxu1 %v645_v61  ;;  %v643_v0 = vld [vmem:[#allocation5] sm:$0xff] }
 0x237   : > { %v644_v62 = vld [vmem:[#allocation5 + $0x8] sm:$0xff] }
 0x238   : > { %669 = vmatpush.msra.mxu1 %v644_v62 }
 0x23a   : > { %670 = vmatpush.msra.mxu1 %v643_v0 }
 0x23b   : > { %766 = vmatmul.msk.f32.vlgmr.msra.gmra.mxu1 %vm484_vm8, %v642_v63 }
 0x2b8   : > { %v672_v2 = vpop.f32.mrf.mxu1 }
 0x2b9   : > { %v701_v3 = vadd.f32 %v700_v1, %v672_v2 }
 0x2bb   : > { %703 = vst.msk [vmem:[%s330_s25] sm:$0xff] %vm380_vm2, %v701_v3 }
 0x2bc PF: > { %s19_s30 = sadd.s32 1, %s813_s30  }
 0x2bd   : > { %p16_p4 = scmp.ge.s32.totalorder %s19_s30, 4  }
 0x2bf   :  { %18 = sbr.rel (!%p16_p4) target bundleno = 1 (0x1), region = 86 }

</bundles_post_ra>
